<compile_context>
chip_gen: v7x
topology: tpu7x:2x2x1
jax: 0.10.0
libtpu: 0.0.40
codegen_flags: <defaults>
</compile_context>

<pallas_src>
import jax
import jax.numpy as jnp
from jax import lax
from jax.experimental import pallas as pl
from jax.experimental.pallas import tpu as pltpu


def _round_up(x: int, m: int) -> int:
    return ((x + m - 1) // m) * m


def _vmem_limit_bytes() -> int:
    """Generation-aware scoped-VMEM limit (~half of physical capacity)."""
    try:
        info = pltpu.get_tpu_info()
        cap = int(getattr(info, "vmem_capacity_bytes", 0) or 0)
        if cap > 0:
            # v7x: 64 MiB -> 32 MiB; v5e/v6e: 128 MiB -> 64 MiB (capped at 96).
            return min(cap // 2, 96 * 1024 * 1024)
    except Exception:
        pass
    return 32 * 1024 * 1024  # safe everywhere (v7x-sized)


def _choose_batch_tile(batch: int, in_features: int, vmem_limit: int) -> int:
    """Rows per grid step: ~2 MiB of lane-padded x per tile, VMEM-clamped,
    a multiple of 128, and small enough that large batches get >= 8 steps."""
    lane_in = _round_up(max(in_features, 1), 128)       # VMEM lane padding
    bt = (2 * 1024 * 1024) // (4 * lane_in)              # ~2 MiB of x per step
    bt = max(512, min(bt, 8192))
    # Two double-buffered x tiles must fit in about half of the VMEM budget.
    budget_rows = (vmem_limit // 2) // (2 * 4 * lane_in)
    bt = min(bt, max(128, budget_rows))
    if batch > bt:
        # >= ~8 grid steps: keeps both v7x TCs fed and bounds padding waste.
        bt = min(bt, _round_up(pl.cdiv(batch, 8), 128))
    bt = max(128, (bt // 128) * 128)
    return bt


def _linear_out1_kernel(x_ref, w_ref, b_ref, o_ref):
    # out_features == 1 fast path: lane-dense [1, tile_b] output via the MXU.
    # x_ref: [tile_b, in] VMEM, w_ref: [1, in] VMEM (PyTorch layout, unmodified),
    # b_ref: [1, 1] VMEM scalar, o_ref: [1, tile_b] VMEM.
    y = lax.dot_general(
        w_ref[...], x_ref[...],
        dimension_numbers=(((1,), (1,)), ((), ())),
        preferred_element_type=jnp.float32,
    )
    o_ref[...] = (y + b_ref[0, 0]).astype(o_ref.dtype)


def _linear_mxu_kernel(x_ref, w_ref, b_ref, o_ref, acc_ref):
    # General out_features > 1 path: K-accumulated tiled matmul (x @ W.T + b).
    # x_ref: [tile_b, k_tile], w_ref: [n_tile, k_tile], b_ref: [1, n_tile],
    # o_ref: [tile_b, n_tile], acc_ref: f32 VMEM scratch [tile_b, n_tile].
    k = pl.program_id(2)

    @pl.when(k == 0)
    def _():
        acc_ref[...] = jnp.zeros_like(acc_ref)

    acc_ref[...] += lax.dot_general(
        x_ref[...], w_ref[...],
        dimension_numbers=(((1,), (1,)), ((), ())),
        preferred_element_type=jnp.float32,
    )

    @pl.when(k == pl.num_programs(2) - 1)
    def _():
        o_ref[...] = (acc_ref[...] + b_ref[...]).astype(o_ref.dtype)


def linear_forward(x, weight, bias, *, batch_tile=None):
    """Pallas equivalent of nn.Linear(in_features, out_features)(x).

    x:      [batch, in_features]        float32
    weight: [out_features, in_features] float32 (PyTorch convention, used as-is)
    bias:   [out_features]              float32
    returns [batch, out_features]       float32
    """
    batch, in_features = x.shape
    out_features, in_features_w = weight.shape
    assert in_features_w == in_features, "weight/in_features mismatch"
    assert bias.shape == (out_features,), "bias shape mismatch"
    dtype = x.dtype

    vmem_limit = _vmem_limit_bytes()

    if batch_tile is None:
        batch_tile = _choose_batch_tile(batch, in_features, vmem_limit)
    else:
        batch_tile = max(128, _round_up(int(batch_tile), 128))
    if batch <= batch_tile:
        batch_tile = _round_up(batch, 128)      # single step, 128-aligned
    padded_batch = _round_up(batch, batch_tile)
    n_bt = padded_batch // batch_tile

    x_p = x
    if padded_batch != batch:
        x_p = jnp.pad(x, ((0, padded_batch - batch), (0, 0)))

    cost = pl.CostEstimate(
        flops=2 * padded_batch * in_features * max(out_features, 1),
        transcendentals=0,
        bytes_accessed=4 * (padded_batch * in_features
                            + out_features * in_features
                            + padded_batch * out_features),
    )

    if out_features == 1:
        out = pl.pallas_call(
            _linear_out1_kernel,
            out_shape=jax.ShapeDtypeStruct((1, padded_batch), dtype),
            grid_spec=pltpu.PrefetchScalarGridSpec(
                num_scalar_prefetch=0,
                grid=(n_bt,),
                in_specs=[
                    pl.BlockSpec((batch_tile, in_features), lambda i: (i, 0)),
                    pl.BlockSpec((1, in_features), lambda i: (0, 0)),   # resident W
                    pl.BlockSpec((1, 1), lambda i: (0, 0)),             # bias scalar
                ],
                out_specs=pl.BlockSpec((1, batch_tile), lambda i: (0, i)),
            ),
            compiler_params=pltpu.CompilerParams(
                dimension_semantics=("parallel",),
                vmem_limit_bytes=vmem_limit,
            ),
            cost_estimate=cost,
        )(x_p, weight, bias.reshape(1, 1))
        # (1, P) -> (P, 1) is a free contiguous reshape; then drop padding rows.
        return out.reshape(padded_batch, 1)[:batch]

    # ---------------- general out_features > 1 fallback (N/K tiled) ----------
    padded_out = _round_up(out_features, 128)
    n_tile = 256 if padded_out % 256 == 0 else 128
    if in_features > 2048:
        k_tile = 512
        padded_in = _round_up(in_features, k_tile)
    else:
        k_tile = in_features
        padded_in = in_features

    w_p, b_p = weight, bias
    if padded_out != out_features or padded_in != in_features:
        w_p = jnp.pad(weight, ((0, padded_out - out_features),
                               (0, padded_in - in_features)))
        b_p = jnp.pad(bias, ((0, padded_out - out_features),))
    if padded_in != in_features:
        x_p = jnp.pad(x_p, ((0, 0), (0, padded_in - in_features)))
    b_p = b_p.reshape(1, padded_out)

    grid = (n_bt, padded_out // n_tile, padded_in // k_tile)
    out = pl.pallas_call(
        _linear_mxu_kernel,
        out_shape=jax.ShapeDtypeStruct((padded_batch, padded_out), dtype),
        grid_spec=pltpu.PrefetchScalarGridSpec(
            num_scalar_prefetch=0,
            grid=grid,
            in_specs=[
                pl.BlockSpec((batch_tile, k_tile), lambda i, j, k: (i, k)),
                pl.BlockSpec((n_tile, k_tile), lambda i, j, k: (j, k)),
                pl.BlockSpec((1, n_tile), lambda i, j, k: (0, j)),
            ],
            out_specs=pl.BlockSpec((batch_tile, n_tile), lambda i, j, k: (i, j)),
            scratch_shapes=[pltpu.VMEM((batch_tile, n_tile), jnp.float32)],
        ),
        compiler_params=pltpu.CompilerParams(
            dimension_semantics=("parallel", "parallel", "arbitrary"),
            vmem_limit_bytes=vmem_limit,
        ),
        cost_estimate=cost,
    )(x_p, w_p, b_p)
    return out[:batch, :out_features]


if __name__ == "__main__":
    # Module-implied small shapes: in_features=32, out_features=1 (default).
    in_features = 32
    out_features = 1
    batch = 8

    key = jax.random.PRNGKey(0)
    kx, kw, kb = jax.random.split(key, 3)
    x = jax.random.normal(kx, (batch, in_features), dtype=jnp.float32)
    weight = jax.random.normal(kw, (out_features, in_features), dtype=jnp.float32) * 0.1
    bias = jax.random.normal(kb, (out_features,), dtype=jnp.float32) * 0.1

    y = jax.block_until_ready(linear_forward(x, weight, bias))
    y_ref = x @ weight.T + bias
    assert y.shape == (batch, out_features)
    assert jnp.allclose(y, y_ref, atol=1e-5, rtol=1e-5)

    # Exercise the multi-step, ragged-batch gridded pipeline (grid of 8 steps).
    x_big = jax.random.normal(jax.random.PRNGKey(1), (1000, in_features), jnp.float32)
    y_big = jax.block_until_ready(linear_forward(x_big, weight, bias, batch_tile=128))
    assert y_big.shape == (1000, 1)
    assert jnp.allclose(y_big, x_big @ weight.T + bias, atol=1e-4, rtol=1e-4)

    # Exercise the general out_features > 1 (N/K-tiled) fallback.
    kw3, kb3 = jax.random.split(jax.random.PRNGKey(2))
    w3 = jax.random.normal(kw3, (3, in_features), dtype=jnp.float32) * 0.1
    b3 = jax.random.normal(kb3, (3,), dtype=jnp.float32) * 0.1
    y3 = jax.block_until_ready(linear_forward(x, w3, b3))
    assert jnp.allclose(y3, x @ w3.T + b3, atol=1e-5, rtol=1e-5)

    print("KERNEL_OK")
</pallas_src>

<mosaic_0001>
module attributes {stable_mosaic.version = 11 : i64} {
  func.func @_linear_out1_kernel(%arg0: i32, %arg1: memref<128x32xf32, #tpu.memory_space<vmem>>, %arg2: memref<1x32xf32, #tpu.memory_space<vmem>>, %arg3: memref<1x1xf32, #tpu.memory_space<vmem>>, %arg4: memref<1x128xf32, #tpu.memory_space<vmem>>) attributes {dimension_semantics = [#tpu.dimension_semantics<parallel>], iteration_bounds = array<i64: 1>, scalar_prefetch = 0 : i64, scratch_operands = 0 : i64, tpu.core_type = #tpu.core_type<tc>, window_params = [{transform_indices = @transform_0, window_bounds = array<i64: 128, 32>}, {pipeline_mode = #tpu.pipeline_mode<synchronous>, transform_indices = @transform_1, window_bounds = array<i64: 1, 32>}, {pipeline_mode = #tpu.pipeline_mode<synchronous>, transform_indices = @transform_2, window_bounds = array<i64: 1, 1>}, {transform_indices = @transform_3, window_bounds = array<i64: 1, 128>}]} {
    %c0 = arith.constant 0 : index
    %c0_0 = arith.constant 0 : index
    %0 = vector.load %arg2[%c0, %c0_0] : memref<1x32xf32, #tpu.memory_space<vmem>>, vector<1x32xf32>
    %c0_1 = arith.constant 0 : index
    %c0_2 = arith.constant 0 : index
    %1 = vector.load %arg1[%c0_1, %c0_2] : memref<128x32xf32, #tpu.memory_space<vmem>>, vector<128x32xf32>
    %cst = arith.constant dense<0.000000e+00> : vector<1x128xf32>
    %2 = tpu.matmul %0, %1, %cst {dimension_numbers = #tpu.dot_dimension_numbers<[1], [1], [0], [0], [0, 0, 1, 0], [], []>} : vector<1x32xf32>, vector<128x32xf32>, vector<1x128xf32> -> vector<1x128xf32>
    %c0_3 = arith.constant 0 : index
    %c0_4 = arith.constant 0 : index
    %3 = vector.load %arg3[%c0_3, %c0_4] : memref<1x1xf32, #tpu.memory_space<vmem>>, vector<1x1xf32>
    %4 = vector.extract %3[0, 0] : f32 from vector<1x1xf32>
    %5 = vector.broadcast %4 : f32 to vector<1x128xf32>
    %6 = arith.addf %2, %5 : vector<1x128xf32>
    %c0_5 = arith.constant 0 : index
    %c0_6 = arith.constant 0 : index
    %7 = vector.load %arg4[%c0_5, %c0_6] : memref<1x128xf32, #tpu.memory_space<vmem>>, vector<1x128xf32>
    tpu.vector_store %arg4[%c0_5, %c0_6], %6 {strides = array<i32>} : memref<1x128xf32, #tpu.memory_space<vmem>>, vector<1x128xf32>,
    return
  }
  func.func @transform_0(%arg0: i32) -> (i32, i32) {
    %c0_i32 = arith.constant 0 : i32
    %c0_i32_0 = arith.constant 0 : i32
    return %arg0, %c0_i32 : i32, i32
  }
  func.func @transform_1(%arg0: i32) -> (i32, i32) {
    %c0_i32 = arith.constant 0 : i32
    %c0_i32_0 = arith.constant 0 : i32
    %c0_i32_1 = arith.constant 0 : i32
    return %c0_i32, %c0_i32_0 : i32, i32
  }
  func.func @transform_2(%arg0: i32) -> (i32, i32) {
    %c0_i32 = arith.constant 0 : i32
    %c0_i32_0 = arith.constant 0 : i32
    %c0_i32_1 = arith.constant 0 : i32
    return %c0_i32, %c0_i32_0 : i32, i32
  }
  func.func @transform_3(%arg0: i32) -> (i32, i32) {
    %c0_i32 = arith.constant 0 : i32
    %c0_i32_0 = arith.constant 0 : i32
    return %c0_i32, %arg0 : i32, i32
  }
}

</mosaic_0001>

<bundles_post_ra>
// kernel: tpu_custom_call.1
= control target key start
LH: loop header
LB: loop body
LE: loop exit
PB: predicated region body
PF: predicated region fallthrough
CT: control target
= control target key end

     0   :  { %s418_s0 = inlined_call_operand.vmem [shape: f32[128,32], index: 0, kind: input, shape index: {}]   ;;  %s419_s1 = inlined_call_operand.vmem [shape: f32[1,32], index: 1, kind: input, shape index: {}]   ;;  %s420_s2 = inlined_call_operand.<no memory space> [shape: f32[1,1], index: 2, kind: input, shape index: {}]   ;;  %s421_s3 = inlined_call_operand.hbm [shape: f32[1,128], index: 3, kind: output, shape index: {}]  }
   0x1   :  { %v8_v0 = vstv %s420_s2 }
   0x2   :  { %9 = vst [vmem:[#allocation2] sm:$0x1] %v8_v0 }
   0x3   :  { %v18_v1 = vld [vmem:[%s418_s0] sm:$0xff]  ;;  %v19_v2 = vld [vmem:[%s418_s0 + $0x8] sm:$0xff]  ;;  %vm37_vm0 = vcmask 261120   ;;  %v305_v3 = vmov 0.0|0.0   ;;  %vm306_vm2 = vmmov 0   ;;  %v307_v6 = vmov 0.0  }
   0x4   :  { %243 = vmatprep.subr.bf16.mxu0 %v305_v3  ;;  %v244_v4 = vpack.c.bf16 %v19_v2, %v18_v1  ;;  %vm340_vm1 = vmpackc.low %vm37_vm0, %vm37_vm0  ;;  %240 = vmatprep.mubr.msk.f32.mxu0 %vm306_vm2, %v307_v6  ;;  %v20_v7 = vld [vmem:[%s418_s0 + $0x10] sm:$0xff]  ;;  %v21_v8 = vld [vmem:[%s418_s0 + $0x18] sm:$0xff] }
   0x6   :  { %246 = vmatpush3.bf16.xpose.msk.msra.mxu0 %vm340_vm1, %v244_v4 }
   0x7   :  { %247 = vmatprep.subr.bf16.mxu0 %v305_v3 }
   0x9   :  { %v34_v9 = vld [vmem:[#allocation2] sm:$0x1] }
   0xa   :  { %10 = vsyncpa [#allocation4], 0  ;;  %v248_v10 = vpack.c.bf16 %v21_v8, %v20_v7  ;;  %275 = vpush %v34_v9  ;;  %v22_v11 = vld [vmem:[%s418_s0 + $0x20] sm:$0xff]  ;;  %v23_v12 = vld [vmem:[%s418_s0 + $0x28] sm:$0xff]  ;;  %s308_s20 = smov [#allocation3]  }
   0xb   :  { %v252_v13 = vpack.c.bf16 %v23_v12, %v22_v11  ;;  %v24_v14 = vld [vmem:[%s418_s0 + $0x30] sm:$0xff]  ;;  %v25_v15 = vld [vmem:[%s418_s0 + $0x38] sm:$0xff]  ;;  %v26_v17 = vld [vmem:[%s418_s0 + $0x40] sm:$0xff]  ;;  %s166_s21 = sshll.u32 %s308_s20, 4  ;;  %s167_s21 = int_to_ptr.vmem [resolvable:$true] %s166_s21 }
   0xc   :  { %v256_v16 = vpack.c.bf16 %v25_v15, %v24_v14  ;;  %v27_v18 = vld [vmem:[%s418_s0 + $0x48] sm:$0xff]  ;;  %v28_v20 = vld [vmem:[%s418_s0 + $0x50] sm:$0xff]  ;;  %v29_v21 = vld [vmem:[%s418_s0 + $0x58] sm:$0xff]  ;;  %s285_s22 = scalar_lea.vmem %s167_s21, 32  ;;  %p286_p1 = scmp.lt.s32.totalorder %s167_s21, %s167_s21 }
   0xd   :  { %v260_v19 = vpack.c.bf16 %v27_v18, %v26_v17  ;;  %v264_v22 = vpack.c.bf16 %v29_v21, %v28_v20  ;;  %v30_v23 = vld [vmem:[%s418_s0 + $0x60] sm:$0xff]  ;;  %v31_v24 = vld [vmem:[%s418_s0 + $0x68] sm:$0xff]  ;;  %v32_v26 = vld [vmem:[%s418_s0 + $0x70] sm:$0xff] }
   0xe   :  { %250 = vmatpush3.bf16.xpose.msk.msra.mxu0 %vm340_vm1, %v248_v10  ;;  %v268_v25 = vpack.c.bf16 %v31_v24, %v30_v23  ;;  %v33_v27 = vld [vmem:[%s418_s0 + $0x78] sm:$0xff]  ;;  %v17_v29 = vld [vmem:[%s419_s1] sm:$0x1]  ;;  %s281_s0 = scalar_lea.vmem %s167_s21, 16 }
   0xf   :  { %251 = vmatprep.subr.bf16.mxu0 %v305_v3  ;;  %v272_v28 = vpack.c.bf16 %v33_v27, %v32_v26  ;;  %p282_p0 = scmp.ne.s32.totalorder %s167_s21, %s281_s0  ;;  %p287_p2 = scmp.lt.s32.totalorder %s285_s22, %s281_s0 }
  0x11   :  { %p288_p3 = por %p287_p2, %p286_p1 }
  0x13   :  { %p289_p4 = pnand %p288_p3, %p282_p0 }
  0x16   :  { %254 = vmatpush3.bf16.xpose.msk.msra.mxu0 %vm340_vm1, %v252_v13 }
  0x17   :  { %255 = vmatprep.subr.bf16.mxu0 %v305_v3 }
  0x1e   :  { %258 = vmatpush3.bf16.xpose.msk.msra.mxu0 %vm340_vm1, %v256_v16 }
  0x1f   :  { %259 = vmatprep.subr.bf16.mxu0 %v305_v3 }
  0x26   :  { %262 = vmatpush3.bf16.xpose.msk.msra.mxu0 %vm340_vm1, %v260_v19 }
  0x27   :  { %263 = vmatprep.subr.bf16.mxu0 %v305_v3 }
  0x2e   :  { %266 = vmatpush3.bf16.xpose.msk.msra.mxu0 %vm340_vm1, %v264_v22 }
  0x2f   :  { %267 = vmatprep.subr.bf16.mxu0 %v305_v3 }
  0x36   :  { %270 = vmatpush3.bf16.xpose.msk.msra.mxu0 %vm340_vm1, %v268_v25 }
  0x37   :  { %271 = vmatprep.subr.bf16.mxu0 %v305_v3 }
  0x3b   :  { %s276_s19 = spop %275 }
  0x3c   :  { %v36_v30 = vstv %s276_s19 }
  0x3e   :  { %274 = vmatpush3.bf16.xpose.msk.msra.mxu0 %vm340_vm1, %v272_v28 }
  0x45   :  { %241 = vmatmul.mubr.msk.f32.vlgmr.msra.gmra.mrb[0].mxu0 %vm37_vm0, %v17_v29 }
 0x118   :  { %v155_v31 = vpop.f32.mrb[0].mxu0 }
 0x119   :  { %v156_v32 = vadd.f32 %v155_v31, %v36_v30  ;;  %v242_v33 = vpop.f32.mrb[1].mxu0 }
 0x11b   :  { %159 = vst [vmem:[#allocation3] sm:$0x1] %v156_v32 }
 0x11c   :  { %292 = shalt.err (!%p289_p4)
}
 0x11d   :  { %s293_s24 = scalar_lea.hbm %s421_s3, 16 }
 0x11e   :  { %p294_p5 = scmp.ne.s32.totalorder %s421_s3, %s293_s24  ;;  %p297_p6 = scmp.lt.u32.totalorder %s293_s24, %s421_s3 }
 0x120   :  { %p299_p7 = pnand %p297_p6, %p294_p5 }
 0x122   :  { %302 = shalt.err (!%p299_p7)
}
 0x123   :  { %169 = dma.vmem_to_hbm [thread:$0]  %s167_s21, 16, %s421_s3, [#allocation4]  }
 0x124   :  { %303 = dma.done.wait [#allocation4], 16  }
 0x125   :  { %304 = vsyncadd [#allocation4], 4294967280 }
 0x126   :  { %173 = vsyncpa [#allocation4], 1 }

</bundles_post_ra>
